<compile_context>
chip_gen: v7x
topology: tpu7x:2x2x1
jax: 0.10.0
libtpu: 0.0.40
codegen_flags: <defaults>
</compile_context>

<pallas_src>
import functools

import jax
import jax.numpy as jnp
from jax import lax
from jax.experimental import pallas as pl
from jax.experimental.pallas import tpu as pltpu


def _gumbel_softmax_kernel(*refs, tau, hard, add_noise):
    """One block of rows: Gumbel-Softmax forward along the last (lane) dim."""
    if add_noise:
        x_ref, g_ref, o_ref = refs
        z = (x_ref[...].astype(jnp.float32)
             + g_ref[...].astype(jnp.float32)) * jnp.float32(1.0 / tau)
    else:                                       # deterministic testing hook
        x_ref, o_ref = refs
        z = x_ref[...].astype(jnp.float32) * jnp.float32(1.0 / tau)

    m = jnp.max(z, axis=-1, keepdims=True)      # single cross-lane row reduction

    if hard:
        # Training forward = exact one-hot at argmax(y_soft) = argmax(z).
        # softmax is dead on this path: no exp, no sum, no divide.  Reuse the
        # row max already computed; first-index tiebreak via iota-min.
        col = lax.broadcasted_iota(jnp.int32, z.shape, z.ndim - 1)
        idx = jnp.min(jnp.where(z >= m, col, jnp.int32(z.shape[-1])),
                      axis=-1, keepdims=True)
        y = jnp.where(col == idx, jnp.float32(1.0), jnp.float32(0.0))
    else:
        e = jnp.exp(z - m)
        s = jnp.sum(e, axis=-1, keepdims=True)
        # Exact reciprocal on the (rows, 1) column only (keeps row-sum accuracy),
        # then a broadcast VALU multiply — no per-element divide.
        y = e * (jnp.float32(1.0) / s)

    o_ref[...] = y.astype(o_ref.dtype)


def _sublane_pack(dtype):
    """Rows per packed sublane group: 8 for f32, 16 for bf16, 32 for int8/fp8."""
    return max(8, 32 // jnp.dtype(dtype).itemsize)


def _choose_tile_rows(n_rows, row_bytes, pack, *,
                      target_bytes=1 << 20, min_bytes=256 << 10, min_steps=8):
    """Rows per grid step: ~target_bytes per input block, rounded to the dtype
    sublane pack, aiming for >= min_steps grid steps (>= 4 per TC on v7x) while
    never shrinking a block below ~min_bytes (per-step overhead ~0.35 us)."""
    if n_rows <= pack:
        return n_rows

    def rup(v):
        return -(-v // pack) * pack

    tile = max(pack, (target_bytes // max(1, row_bytes)) // pack * pack)
    rows_per_step = rup(-(-n_rows // min_steps))                 # ceil/min_steps
    rows_for_min_bytes = rup(max(1, -(-min_bytes // max(1, row_bytes))))
    tile = max(pack, min(tile, max(rows_per_step, rows_for_min_bytes)))
    return n_rows if tile >= n_rows else tile


def gumbel_softmax(x, *, tau=1.0, hard=False, key=None, seed=0, add_noise=True):
    """Pallas GumbelSoftmax forward.

    hard=True  -> training-mode forward (exact one-hot sample).
    hard=False -> eval-mode forward (soft sample).
    add_noise=False disables the Gumbel noise (deterministic testing hook).
    Output has the same shape/dtype as the (float) input.
    """
    if not jnp.issubdtype(x.dtype, jnp.floating):
        x = x.astype(jnp.float32)
    orig_shape = x.shape
    n_classes = orig_shape[-1]
    n_rows = max(1, x.size // n_classes)
    x2d = x.reshape(n_rows, n_classes)            # metadata-only reshape

    pack = _sublane_pack(x2d.dtype)
    row_bytes = n_classes * x2d.dtype.itemsize
    tile_rows = _choose_tile_rows(n_rows, row_bytes, pack)
    grid = (pl.cdiv(n_rows, tile_rows),)

    block = pl.BlockSpec((tile_rows, n_classes), lambda i: (i, 0))
    operands = [x2d]
    in_specs = [block]
    if add_noise:
        if key is None:
            key = jax.random.PRNGKey(seed)
        # Gumbel(0,1) noise from the standard JAX PRNG (pltpu.prng_* has no
        # interpret/CPU lowering); streamed at native dtype width.
        g2d = jax.random.gumbel(key, x2d.shape, dtype=jnp.float32).astype(x2d.dtype)
        operands.append(g2d)
        in_specs.append(block)

    kernel = functools.partial(
        _gumbel_softmax_kernel,
        tau=float(tau), hard=bool(hard), add_noise=bool(add_noise),
    )

    y2d = pl.pallas_call(
        kernel,
        out_shape=jax.ShapeDtypeStruct((n_rows, n_classes), x2d.dtype),
        grid=grid,
        in_specs=in_specs,
        out_specs=block,
        compiler_params=pltpu.CompilerParams(
            dimension_semantics=("parallel",),
            # Headroom for f32 intermediates on top of double-buffered native
            # tiles; under v7x's 64 MiB/TC and v5e/v6e's 128 MiB physical VMEM.
            vmem_limit_bytes=48 * 1024 * 1024,
        ),
    )(*operands)

    # TODO(synk): for tiny class counts (<128) the last dim is not lane-dense;
    # repacking several rows per lane group would recover store bandwidth.
    return y2d.reshape(orig_shape)


if __name__ == "__main__":
    root = jax.random.PRNGKey(0)
    key_x, key_g = jax.random.split(root)
    # Logits over 128 classes (lane-dense last dim), batch 2 x 16 rows.
    x = jax.random.normal(key_x, (2, 16, 128), dtype=jnp.float32)
    tau = 1.0

    # --- exact-math check with Gumbel noise disabled (testing hook) ---
    y_soft_nn = jax.block_until_ready(
        gumbel_softmax(x, tau=tau, hard=False, add_noise=False))
    y_hard_nn = jax.block_until_ready(
        gumbel_softmax(x, tau=tau, hard=True, add_noise=False))
    ref_soft = jax.nn.softmax(x / tau, axis=-1)
    ref_hard = jax.nn.one_hot(jnp.argmax(x, axis=-1), x.shape[-1], dtype=x.dtype)
    assert jnp.allclose(y_soft_nn, ref_soft, atol=1e-6), "soft path mismatch"
    assert jnp.allclose(y_hard_nn, ref_hard, atol=0.0), "hard path mismatch"

    # --- real Gumbel-Softmax, eval mode (hard=False): valid soft distribution ---
    y_eval = jax.block_until_ready(
        gumbel_softmax(x, tau=tau, hard=False, key=key_g))
    assert y_eval.shape == x.shape
    assert bool(jnp.all(y_eval >= 0.0)) and bool(jnp.all(y_eval <= 1.0))
    assert jnp.allclose(jnp.sum(y_eval, axis=-1), 1.0, atol=1e-5), "rows must sum to 1"

    # --- real Gumbel-Softmax, training mode (hard=True): exact one-hot forward ---
    y_train = jax.block_until_ready(
        gumbel_softmax(x, tau=tau, hard=True, key=key_g))
    assert y_train.shape == x.shape
    assert bool(jnp.all((y_train == 0.0) | (y_train == 1.0))), "hard output must be 0/1"
    assert bool(jnp.all(jnp.sum(y_train, axis=-1) == 1.0)), "hard output must be one-hot"
    # Same key => same noise => hard one-hot sits at the soft sample's argmax.
    assert bool(jnp.all(jnp.argmax(y_train, axis=-1) == jnp.argmax(y_eval, axis=-1)))

    # --- dtype-preserving path: bf16 in -> bf16 out (no wrapper casts on x) ---
    xb = x.astype(jnp.bfloat16)
    yb = jax.block_until_ready(gumbel_softmax(xb, tau=tau, hard=False, key=key_g))
    assert yb.dtype == jnp.bfloat16
    assert jnp.allclose(jnp.sum(yb.astype(jnp.float32), axis=-1), 1.0, atol=2e-2)

    # TODO(synk): straight-through gradient (y_hard - sg(y_soft) + y_soft) is an
    # autograd construct; only the forward value (exact one-hot) is implemented.
    print("KERNEL_OK")
</pallas_src>

<mosaic_0001>
module attributes {stable_mosaic.version = 11 : i64} {
  func.func @_gumbel_softmax_kernel(%arg0: i32, %arg1: memref<32x128xf32, #tpu.memory_space<vmem>>, %arg2: memref<32x128xf32, #tpu.memory_space<vmem>>) attributes {dimension_semantics = [#tpu.dimension_semantics<parallel>], iteration_bounds = array<i64: 1>, scalar_prefetch = 0 : i64, scratch_operands = 0 : i64, tpu.core_type = #tpu.core_type<tc>, window_params = [{transform_indices = @transform_0, window_bounds = array<i64: 32, 128>}, {transform_indices = @transform_1, window_bounds = array<i64: 32, 128>}]} {
    %c0 = arith.constant 0 : index
    %c0_0 = arith.constant 0 : index
    %0 = vector.load %arg1[%c0, %c0_0] : memref<32x128xf32, #tpu.memory_space<vmem>>, vector<32x128xf32>
    %cst = arith.constant 1.000000e+00 : f32
    %1 = vector.broadcast %cst : f32 to vector<32x128xf32>
    %2 = arith.mulf %0, %1 : vector<32x128xf32>
    %cst_1 = arith.constant dense<0xFF800000> : vector<32xf32>
    %3 = vector.multi_reduction <maximumf>, %2, %cst_1 [1] : vector<32x128xf32> to vector<32xf32>
    %4 = vector.shape_cast %3 : vector<32xf32> to vector<32x1xf32>
    %5 = vector.broadcast %4 : vector<32x1xf32> to vector<32x128xf32>
    %6 = arith.subf %2, %5 : vector<32x128xf32>
    %7 = math.exp %6 : vector<32x128xf32>
    %cst_2 = arith.constant dense<0.000000e+00> : vector<32xf32>
    %8 = vector.multi_reduction <add>, %7, %cst_2 [1] : vector<32x128xf32> to vector<32xf32>
    %9 = vector.shape_cast %8 : vector<32xf32> to vector<32x1xf32>
    %cst_3 = arith.constant 1.000000e+00 : f32
    %10 = vector.broadcast %cst_3 : f32 to vector<32x1xf32>
    %11 = arith.divf %10, %9 : vector<32x1xf32>
    %12 = vector.broadcast %11 : vector<32x1xf32> to vector<32x128xf32>
    %13 = arith.mulf %7, %12 : vector<32x128xf32>
    %c0_4 = arith.constant 0 : index
    %c0_5 = arith.constant 0 : index
    %14 = vector.load %arg2[%c0_4, %c0_5] : memref<32x128xf32, #tpu.memory_space<vmem>>, vector<32x128xf32>
    tpu.vector_store %arg2[%c0_4, %c0_5], %13 {strides = array<i32>} : memref<32x128xf32, #tpu.memory_space<vmem>>, vector<32x128xf32>,
    return
  }
  func.func @transform_0(%arg0: i32) -> (i32, i32) {
    %c0_i32 = arith.constant 0 : i32
    %c0_i32_0 = arith.constant 0 : i32
    return %arg0, %c0_i32 : i32, i32
  }
  func.func @transform_1(%arg0: i32) -> (i32, i32) {
    %c0_i32 = arith.constant 0 : i32
    %c0_i32_0 = arith.constant 0 : i32
    return %arg0, %c0_i32 : i32, i32
  }
}

</mosaic_0001>

<bundles_post_ra>
// kernel: tpu_custom_call.1
= control target key start
LH: loop header
LB: loop body
LE: loop exit
PB: predicated region body
PF: predicated region fallthrough
CT: control target
= control target key end

     0   :  { %6 = vsyncpa [#allocation3], 0  ;;  %s200_s0 = inlined_call_operand.hbm [shape: f32[32,128], index: 0, kind: input, shape index: {}]   ;;  %s201_s1 = inlined_call_operand.hbm [shape: f32[32,128], index: 1, kind: output, shape index: {}]  }
   0x1   :  { %7 = vsyncpa [#allocation4], 0  ;;  %s156_s6 = smov [#allocation2]   ;;  %s108_s10 = scalar_lea.hbm %s200_s0, 512 }
   0x2   :  { %s13_s7 = sshll.u32 %s156_s6, 4  ;;  %p109_p0 = scmp.ne.s32.totalorder %s200_s0, %s108_s10  ;;  %s14_s7 = int_to_ptr.vmem [resolvable:$true] %s13_s7 }
   0x3   :  { %p112_p1 = scmp.lt.u32.totalorder %s108_s10, %s200_s0 }
   0x5   :  { %p114_p2 = pnand %p112_p1, %p109_p0 }
   0x7   :  { %117 = shalt.err (!%p114_p2)
}
   0x8   :  { %s118_s15 = scalar_lea.vmem %s14_s7, 512  ;;  %p123_p4 = scmp.lt.s32.totalorder %s14_s7, %s14_s7 }
   0x9   :  { %p119_p3 = scmp.ne.s32.totalorder %s14_s7, %s118_s15  ;;  %p124_p5 = scmp.lt.s32.totalorder %s118_s15, %s118_s15 }
   0xb   :  { %p125_p6 = por %p124_p5, %p123_p4 }
   0xd   :  { %p126_p7 = pnand %p125_p6, %p119_p3 }
   0xf   :  { %129 = shalt.err (!%p126_p7)
}
  0x10   :  { %s157_s16 = smov 128   ;;  %s158_s17 = smov 8  }
  0x11   :  { %19 = dma.hbm_to_vmem [thread:$0]  %s200_s0, 512, %s14_s7, [#allocation3], %s157_s16, %s157_s16, %s158_s17  }
  0x12   :  { %152 = dma.done.wait [#allocation3], 512  }
  0x13   :  { %153 = vsyncadd [#allocation3], 4294966784  ;;  %v23_v0 = vld [vmem:[#allocation2] sm:$0xff]  ;;  %v25_v1 = vld [vmem:[#allocation2 + $0x10] sm:$0xff]  ;;  %s159_s0 = smov [#allocation5]  }
  0x14   :  { %27 = vmax.xlane.f32.xlu0 %v23_v0  ;;  %31 = vmax.xlane.f32.xlu1 %v25_v1  ;;  %v24_v2 = vld [vmem:[#allocation2 + $0x8] sm:$0xff]  ;;  %v26_v3 = vld [vmem:[#allocation2 + $0x18] sm:$0xff]  ;;  %s76_s20 = sshll.u32 %s159_s0, 4  ;;  %s77_s20 = int_to_ptr.vmem [resolvable:$true] %s76_s20 }
  0x15   :  { %s130_s21 = scalar_lea.vmem %s77_s20, 512  ;;  %p135_p9 = scmp.lt.s32.totalorder %s77_s20, %s77_s20 }
  0x16   :  { %p131_p8 = scmp.ne.s32.totalorder %s77_s20, %s130_s21  ;;  %p136_p10 = scmp.lt.s32.totalorder %s130_s21, %s130_s21 }
  0x18   :  { %29 = vmax.xlane.f32.xlu0 %v24_v2  ;;  %33 = vmax.xlane.f32.xlu1 %v26_v3  ;;  %p137_p11 = por %p136_p10, %p135_p9 }
  0x1a   :  { %p138_p12 = pnand %p137_p11, %p131_p8 }
  0xa1   :  { %v28_v4 = vpop.xlane.xlu0 %27  ;;  %v32_v5 = vpop.xlane.xlu1 %31 }
  0xa2   :  { %v35_v6 = vsub.f32 %v23_v0, %v28_v4  ;;  %v37_v7 = vsub.f32 %v25_v1, %v32_v5 }
  0xa4   :  { %v39_v8 = vmul.f32 1.442695, %v35_v6  ;;  %v43_v9 = vmul.f32 1.442695, %v37_v7 }
  0xa5   :  { %v30_v10 = vpop.xlane.xlu0 %29  ;;  %v34_v11 = vpop.xlane.xlu1 %33 }
  0xa6   :  { %92 = vpow2.f32 %v39_v8  ;;  %v36_v12 = vsub.f32 %v24_v2, %v30_v10  ;;  %v38_v13 = vsub.f32 %v26_v3, %v34_v11 }
  0xa7   :  { %94 = vpow2.f32 %v43_v9 }
  0xa8   :  { %v41_v14 = vmul.f32 1.442695, %v36_v12  ;;  %v45_v15 = vmul.f32 1.442695, %v38_v13 }
  0xaa   :  { %96 = vpow2.f32 %v41_v14 }
  0xab   :  { %98 = vpow2.f32 %v45_v15 }
  0xb0   :  { %v93_v16 = vpop.eup %92 }
  0xb1   :  { %47 = vadd.xlane.f32.xlu0 %v93_v16  ;;  %v95_v17 = vpop.eup %94 }
  0xb4   :  { %v97_v18 = vpop.eup %96 }
  0xb5   :  { %51 = vadd.xlane.f32.xlu0 %v95_v17  ;;  %49 = vadd.xlane.f32.xlu1 %v97_v18  ;;  %v99_v19 = vpop.eup %98 }
  0xb9   :  { %53 = vadd.xlane.f32.xlu1 %v99_v19 }
 0x13e   :  { %v48_v20 = vpop.xlane.xlu0 %47 }
 0x13f   :  { %100 = vrcp.f32 %v48_v20 }
 0x142   :  { %v50_v21 = vpop.xlane.xlu1 %49  ;;  %v52_v22 = vpop.xlane.xlu0 %51 }
 0x143   :  { %102 = vrcp.f32 %v50_v21 }
 0x144   :  { %104 = vrcp.f32 %v52_v22 }
 0x146   :  { %v54_v23 = vpop.xlane.xlu1 %53 }
 0x147   :  { %106 = vrcp.f32 %v54_v23 }
 0x149   :  { %v101_v24 = vpop.eup %100 }
 0x14a   :  { %v63_v25 = vmul.f32 %v101_v24, %v93_v16 }
 0x14c   :  { %67 = vst [vmem:[#allocation5] sm:$0xff] %v63_v25 }
 0x14d   :  { %v103_v26 = vpop.eup %102 }
 0x14e   :  { %v105_v27 = vpop.eup %104  ;;  %v64_v28 = vmul.f32 %v103_v26, %v97_v18 }
 0x14f   :  { %v65_v29 = vmul.f32 %v105_v27, %v95_v17 }
 0x150   :  { %68 = vst [vmem:[#allocation5 + $0x8] sm:$0xff] %v64_v28 }
 0x151   :  { %v107_v30 = vpop.eup %106  ;;  %69 = vst [vmem:[#allocation5 + $0x10] sm:$0xff] %v65_v29 }
 0x152   :  { %v66_v31 = vmul.f32 %v107_v30, %v99_v19 }
 0x154   :  { %70 = vst [vmem:[#allocation5 + $0x18] sm:$0xff] %v66_v31 }
 0x155   :  { %141 = shalt.err (!%p138_p12)
}
 0x156   :  { %s142_s24 = scalar_lea.hbm %s201_s1, 512 }
 0x157   :  { %p143_p13 = scmp.ne.s32.totalorder %s201_s1, %s142_s24  ;;  %p146_p0 = scmp.lt.u32.totalorder %s142_s24, %s201_s1 }
 0x159   :  { %p148_p1 = pnand %p146_p0, %p143_p13 }
 0x15b   :  { %151 = shalt.err (!%p148_p1)
}
 0x15c   :  { %82 = dma.vmem_to_hbm [thread:$0]  %s77_s20, 512, %s201_s1, [#allocation4], %s157_s16, %s157_s16, %s158_s17  }
 0x15d   :  { %154 = dma.done.wait [#allocation4], 512  }
 0x15e   :  { %155 = vsyncadd [#allocation4], 4294966784 }
 0x15f   :  { %86 = vsyncpa [#allocation3], 1 }
 0x160   :  { %87 = vsyncpa [#allocation4], 1 }

</bundles_post_ra>
